<compile_context>
chip_gen: v7x
topology: tpu7x:2x2x1
jax: 0.10.0
libtpu: 0.0.40
codegen_flags: <defaults>
</compile_context>

<pallas_src>
import jax
import jax.numpy as jnp
from jax.experimental import pallas as pl
from jax.experimental.pallas import tpu as pltpu

# ---------------- problem sizes (small, consistent with the module) ----------
B, S = 2, 8                  # batch, sequence (flattened into matmul rows)
IN_FEATURES = 32
OUT_FEATURES = 64
M = B * S                    # 16 rows -> sublane-aligned (multiple of 8)
NEG_SLOPE = 0.2              # LeakyReLU negative slope


# ---------------------------- Pallas kernel ----------------------------------
def fclayer_kernel(x_ref, w_ref, b_ref, o_ref):
    # x_ref: (M, IN)   w_ref: (IN, OUT)   b_ref: (1, OUT)   o_ref: (M, OUT)
    acc = jnp.dot(x_ref[...], w_ref[...], preferred_element_type=jnp.float32)
    acc = acc + b_ref[...]                                  # bias broadcast (VPU)
    o_ref[...] = jnp.where(acc >= 0.0, acc, NEG_SLOPE * acc).astype(o_ref.dtype)


@jax.jit
def fclayer_forward(x, weight, bias):
    """FClayer forward.

    x:      [B, S, IN_FEATURES]  float32
    weight: [OUT_FEATURES, IN_FEATURES]  (PyTorch nn.Linear layout)
    bias:   [OUT_FEATURES]
    """
    x_flat = x.reshape(M, IN_FEATURES)            # fold batch*seq into matmul M
    w_t = weight.T                                 # (IN, OUT): lane-dense RHS
    b2 = bias.reshape(1, OUT_FEATURES)

    out_flat = pl.pallas_call(
        fclayer_kernel,
        out_shape=jax.ShapeDtypeStruct((M, OUT_FEATURES), jnp.float32),
        grid_spec=pltpu.PrefetchScalarGridSpec(
            num_scalar_prefetch=0,
            grid=(1,),                            # single fused step
            in_specs=[
                pl.BlockSpec((M, IN_FEATURES), lambda i: (0, 0)),
                pl.BlockSpec((IN_FEATURES, OUT_FEATURES), lambda i: (0, 0)),
                pl.BlockSpec((1, OUT_FEATURES), lambda i: (0, 0)),
            ],
            out_specs=pl.BlockSpec((M, OUT_FEATURES), lambda i: (0, 0)),
        ),
        compiler_params=pltpu.CompilerParams(
            dimension_semantics=("arbitrary",),
        ),
        cost_estimate=pl.CostEstimate(
            flops=2 * M * IN_FEATURES * OUT_FEATURES,
            transcendentals=0,
            bytes_accessed=4 * (M * IN_FEATURES
                                + IN_FEATURES * OUT_FEATURES
                                + OUT_FEATURES
                                + M * OUT_FEATURES),
        ),
    )(x_flat, w_t, b2)

    return out_flat.reshape(B, S, OUT_FEATURES)


# ------------------------------ pure-JAX reference ---------------------------
def fclayer_reference(x, weight, bias):
    y = jnp.einsum("bsi,oi->bso", x, weight) + bias
    return jnp.where(y >= 0.0, y, NEG_SLOPE * y)


# ----------------------------------- main -------------------------------------
if __name__ == "__main__":
    key = jax.random.PRNGKey(0)
    kx, kw, kb = jax.random.split(key, 3)

    x = jax.random.normal(kx, (B, S, IN_FEATURES), dtype=jnp.float32)
    # nn.Linear(32, 64, bias=True) parameters: weight [64, 32], bias [64]
    bound = float(1.0 / jnp.sqrt(IN_FEATURES))
    weight = jax.random.uniform(kw, (OUT_FEATURES, IN_FEATURES),
                                dtype=jnp.float32, minval=-bound, maxval=bound)
    bias = jax.random.uniform(kb, (OUT_FEATURES,),
                              dtype=jnp.float32, minval=-bound, maxval=bound)

    out = jax.block_until_ready(fclayer_forward(x, weight, bias))
    ref = jax.block_until_ready(fclayer_reference(x, weight, bias))

    assert out.shape == (B, S, OUT_FEATURES), out.shape
    assert jnp.max(jnp.abs(out - ref)) < 1e-4, float(jnp.max(jnp.abs(out - ref)))

    print("KERNEL_OK")
</pallas_src>

<mosaic_0001>
module attributes {stable_mosaic.version = 11 : i64} {
  func.func @fclayer_kernel(%arg0: i32, %arg1: memref<16x32xf32, #tpu.memory_space<vmem>>, %arg2: memref<32x64xf32, #tpu.memory_space<vmem>>, %arg3: memref<1x64xf32, #tpu.memory_space<vmem>>, %arg4: memref<16x64xf32, #tpu.memory_space<vmem>>) attributes {dimension_semantics = [#tpu.dimension_semantics<arbitrary>], iteration_bounds = array<i64: 1>, scalar_prefetch = 0 : i64, scratch_operands = 0 : i64, tpu.core_type = #tpu.core_type<tc>, window_params = [{pipeline_mode = #tpu.pipeline_mode<synchronous>, transform_indices = @transform_0, window_bounds = array<i64: 16, 32>}, {pipeline_mode = #tpu.pipeline_mode<synchronous>, transform_indices = @transform_1, window_bounds = array<i64: 32, 64>}, {pipeline_mode = #tpu.pipeline_mode<synchronous>, transform_indices = @transform_2, window_bounds = array<i64: 1, 64>}, {pipeline_mode = #tpu.pipeline_mode<synchronous>, transform_indices = @transform_3, window_bounds = array<i64: 16, 64>}]} {
    %c0 = arith.constant 0 : index
    %c0_0 = arith.constant 0 : index
    %0 = vector.load %arg1[%c0, %c0_0] : memref<16x32xf32, #tpu.memory_space<vmem>>, vector<16x32xf32>
    %c0_1 = arith.constant 0 : index
    %c0_2 = arith.constant 0 : index
    %1 = vector.load %arg2[%c0_1, %c0_2] : memref<32x64xf32, #tpu.memory_space<vmem>>, vector<32x64xf32>
    %cst = arith.constant dense<0.000000e+00> : vector<16x64xf32>
    %2 = tpu.matmul %0, %1, %cst {dimension_numbers = #tpu.dot_dimension_numbers<[1], [0], [0], [1], [0, 0, 1, 1], [], []>} : vector<16x32xf32>, vector<32x64xf32>, vector<16x64xf32> -> vector<16x64xf32>
    %c0_3 = arith.constant 0 : index
    %c0_4 = arith.constant 0 : index
    %3 = vector.load %arg3[%c0_3, %c0_4] : memref<1x64xf32, #tpu.memory_space<vmem>>, vector<1x64xf32>
    %4 = vector.broadcast %3 : vector<1x64xf32> to vector<16x64xf32>
    %5 = arith.addf %2, %4 : vector<16x64xf32>
    %cst_5 = arith.constant 0.000000e+00 : f32
    %6 = vector.broadcast %cst_5 : f32 to vector<16x64xf32>
    %7 = arith.cmpf oge, %5, %6 : vector<16x64xf32>
    %cst_6 = arith.constant 2.000000e-01 : f32
    %8 = vector.broadcast %cst_6 : f32 to vector<16x64xf32>
    %9 = arith.mulf %8, %5 : vector<16x64xf32>
    %10 = arith.select %7, %5, %9 : vector<16x64xi1>, vector<16x64xf32>
    %c0_7 = arith.constant 0 : index
    %c0_8 = arith.constant 0 : index
    %11 = vector.load %arg4[%c0_7, %c0_8] : memref<16x64xf32, #tpu.memory_space<vmem>>, vector<16x64xf32>
    tpu.vector_store %arg4[%c0_7, %c0_8], %10 {strides = array<i32>} : memref<16x64xf32, #tpu.memory_space<vmem>>, vector<16x64xf32>,
    return
  }
  func.func @transform_0(%arg0: i32) -> (i32, i32) {
    %c0_i32 = arith.constant 0 : i32
    %c0_i32_0 = arith.constant 0 : i32
    %c0_i32_1 = arith.constant 0 : i32
    return %c0_i32, %c0_i32_0 : i32, i32
  }
  func.func @transform_1(%arg0: i32) -> (i32, i32) {
    %c0_i32 = arith.constant 0 : i32
    %c0_i32_0 = arith.constant 0 : i32
    %c0_i32_1 = arith.constant 0 : i32
    return %c0_i32, %c0_i32_0 : i32, i32
  }
  func.func @transform_2(%arg0: i32) -> (i32, i32) {
    %c0_i32 = arith.constant 0 : i32
    %c0_i32_0 = arith.constant 0 : i32
    %c0_i32_1 = arith.constant 0 : i32
    return %c0_i32, %c0_i32_0 : i32, i32
  }
  func.func @transform_3(%arg0: i32) -> (i32, i32) {
    %c0_i32 = arith.constant 0 : i32
    %c0_i32_0 = arith.constant 0 : i32
    %c0_i32_1 = arith.constant 0 : i32
    return %c0_i32, %c0_i32_0 : i32, i32
  }
}

</mosaic_0001>

<bundles_post_ra>
// kernel: fclayer_forward.1
= control target key start
LH: loop header
LB: loop body
LE: loop exit
PB: predicated region body
PF: predicated region fallthrough
CT: control target
= control target key end

     0   :  { %8 = vsyncpa [#allocation3], 0  ;;  %s343_s0 = inlined_call_operand.hbm [shape: f32[16,32], index: 0, kind: input, shape index: {}]   ;;  %s344_s1 = inlined_call_operand.hbm [shape: f32[32,64], index: 1, kind: input, shape index: {}]   ;;  %s345_s2 = inlined_call_operand.vmem [shape: f32[1,64], index: 2, kind: input, shape index: {}]   ;;  %s346_s3 = inlined_call_operand.hbm [shape: f32[16,64], index: 3, kind: output, shape index: {}]  }
   0x1   :  { %9 = vsyncpa [#allocation6], 0 }
   0x2   :  { %10 = vsyncpa [#allocation4], 0  ;;  %s270_s12 = smov [#allocation2]   ;;  %s198_s16 = scalar_lea.hbm %s343_s0, 256 }
   0x3   :  { %s16_s13 = sshll.u32 %s270_s12, 4  ;;  %p199_p0 = scmp.ne.s32.totalorder %s343_s0, %s198_s16  ;;  %s17_s13 = int_to_ptr.vmem [resolvable:$true] %s16_s13 }
   0x4   :  { %p202_p1 = scmp.lt.u32.totalorder %s198_s16, %s343_s0 }
   0x6   :  { %p204_p2 = pnand %p202_p1, %p199_p0 }
   0x8   :  { %207 = shalt.err (!%p204_p2)
}
   0x9   :  { %s208_s21 = scalar_lea.vmem %s17_s13, 256  ;;  %p213_p4 = scmp.lt.s32.totalorder %s17_s13, %s17_s13 }
   0xa   :  { %p209_p3 = scmp.ne.s32.totalorder %s17_s13, %s208_s21  ;;  %p214_p5 = scmp.lt.s32.totalorder %s208_s21, %s208_s21 }
   0xc   :  { %p215_p6 = por %p214_p5, %p213_p4 }
   0xe   :  { %p216_p7 = pnand %p215_p6, %p209_p3 }
  0x10   :  { %219 = shalt.err (!%p216_p7)
}
  0x11   :  { %s271_s22 = smov 128   ;;  %s272_s23 = smov 8  }
  0x12   :  { %22 = dma.hbm_to_vmem [thread:$0]  %s343_s0, 256, %s17_s13, [#allocation3], %s271_s22, %s271_s22, %s272_s23  }
  0x13   :  { %s273_s26 = smov [#allocation5]   ;;  %s220_s30 = scalar_lea.hbm %s344_s1, 512 }
  0x14   :  { %s28_s27 = sshll.u32 %s273_s26, 4  ;;  %p221_p8 = scmp.ne.s32.totalorder %s344_s1, %s220_s30  ;;  %s29_s27 = int_to_ptr.vmem [resolvable:$true] %s28_s27 }
  0x15   :  { %p224_p9 = scmp.lt.u32.totalorder %s220_s30, %s344_s1 }
  0x17   :  { %p226_p10 = pnand %p224_p9, %p221_p8 }
  0x19   :  { %229 = shalt.err (!%p226_p10)
}
  0x1a   :  { %s230_s8 = scalar_lea.vmem %s29_s27, 512  ;;  %p235_p12 = scmp.lt.s32.totalorder %s29_s27, %s29_s27 }
  0x1b   :  { %p231_p11 = scmp.ne.s32.totalorder %s29_s27, %s230_s8  ;;  %p236_p13 = scmp.lt.s32.totalorder %s230_s8, %s230_s8 }
  0x1d   :  { %p237_p0 = por %p236_p13, %p235_p12 }
  0x1f   :  { %p238_p1 = pnand %p237_p0, %p231_p11 }
  0x21   :  { %241 = shalt.err (!%p238_p1)
}
  0x22   :  { %34 = dma.hbm_to_vmem [thread:$0]  %s344_s1, 512, %s29_s27, [#allocation6], %s271_s22, %s271_s22, %s272_s23  }
  0x23   :  { %264 = dma.done.wait [#allocation3], 256  }
  0x24   :  { %265 = vsyncadd [#allocation3], 4294967040 }
  0x25   :  { %266 = dma.done.wait [#allocation6], 512  }
  0x26   :  { %267 = vsyncadd [#allocation6], 4294966784  ;;  %vm56_vm0 = vcmask 261120   ;;  %v45_v0 = vld [vmem:[#allocation5] sm:$0xff]  ;;  %v46_v1 = vld [vmem:[#allocation5 + $0x8] sm:$0xff]  ;;  %s274_s11 = smov [#allocation7]  }
  0x27   :  { %v47_v2 = vld [vmem:[#allocation5 + $0x10] sm:$0xff]  ;;  %v185_v3 = vpack.c.bf16 %v46_v1, %v45_v0  ;;  %v48_v4 = vld [vmem:[#allocation5 + $0x18] sm:$0xff]  ;;  %s152_s12 = sshll.u32 %s274_s11, 4  ;;  %vm144_vm2 = vcmask 523264   ;;  %s153_s12 = int_to_ptr.vmem [resolvable:$true] %s152_s12 }
  0x28   :  { %v43_v5 = vld [vmem:[#allocation2] sm:$0xff]  ;;  %v189_v6 = vpack.c.bf16 %v48_v4, %v47_v2  ;;  %v44_v7 = vld [vmem:[#allocation2 + $0x8] sm:$0xff]  ;;  %s242_s13 = scalar_lea.vmem %s153_s12, 256  ;;  %p247_p3 = scmp.lt.s32.totalorder %s153_s12, %s153_s12 }
  0x29   :  { %182 = vmatprep.mubr.msk.f32.mxu0 %vm56_vm0, %v43_v5  ;;  %186 = vmatprep.subr.bf16.mxu0 %v185_v3  ;;  %v165_v8 = vld [vmem:[%s345_s2] ss:$0 sm:$0xff]  ;;  %p243_p2 = scmp.ne.s32.totalorder %s153_s12, %s242_s13  ;;  %p248_p4 = scmp.lt.s32.totalorder %s242_s13, %s242_s13 }
  0x2a   :  { %188 = vmatpush3.bf16.msra.mxu0 %v185_v3 }
  0x2b   :  { %190 = vmatprep.subr.bf16.mxu0 %v189_v6  ;;  %p249_p5 = por %p248_p4, %p247_p3 }
  0x2d   :  { %p250_p6 = pnand %p249_p5, %p243_p2 }
  0x2e   :  { %192 = vmatpush3.bf16.msra.mxu0 %v189_v6 }
  0x31   :  { %183 = vmatmul.mubr.msk.f32.vlgmr.msra.gmra.mrb[0].mxu0 %vm56_vm0, %v44_v7 }
 0x104   :  { %v184_v9 = vpop.f32.mrb[0].mxu0 }
 0x105   :  { %v135_v10 = vadd.f32 %v184_v9, %v165_v8  ;;  %v129_v11 = vpop.f32.mrb[1].mxu0 }
 0x106   :  { %v130_v12 = vadd.f32 %v165_v8, %v129_v11 }
 0x107   :  { %vm139_vm1 = vcmp.ge.f32.partialorder %v135_v10, 0.0  ;;  %v141_v13 = vmul.f32 0.2, %v135_v10 }
 0x108   :  { %vm138_vm3 = vcmp.ge.f32.partialorder %v130_v12, 0.0  ;;  %v140_v14 = vmul.f32 0.2, %v130_v12 }
 0x109   :  { %v143_v15 = vsel %vm139_vm1, %v135_v10, %v141_v13 }
 0x10a   :  { %v142_v16 = vsel %vm138_vm3, %v130_v12, %v140_v14  ;;  %146 = vst.msk [vmem:[#allocation7 + $0x8] sm:$0xff] %vm144_vm2, %v143_v15 }
 0x10b   :  { %145 = vst.msk [vmem:[#allocation7] sm:$0xff] %vm144_vm2, %v142_v16 }
 0x10c   :  { %253 = shalt.err (!%p250_p6)
}
 0x10d   :  { %s254_s15 = scalar_lea.hbm %s346_s3, 256 }
 0x10e   :  { %p255_p7 = scmp.ne.s32.totalorder %s346_s3, %s254_s15  ;;  %p258_p8 = scmp.lt.u32.totalorder %s254_s15, %s346_s3 }
 0x110   :  { %p260_p9 = pnand %p258_p8, %p255_p7 }
 0x112   :  { %263 = shalt.err (!%p260_p9)
}
 0x113   :  { %158 = dma.vmem_to_hbm [thread:$0]  %s153_s12, 256, %s346_s3, [#allocation4], %s271_s22, %s271_s22, %s272_s23  }
 0x114   :  { %268 = dma.done.wait [#allocation4], 256  }
 0x115   :  { %269 = vsyncadd [#allocation4], 4294967040 }
 0x116   :  { %162 = vsyncpa [#allocation3], 1 }
 0x117   :  { %163 = vsyncpa [#allocation6], 1 }
 0x118   :  { %164 = vsyncpa [#allocation4], 1 }

</bundles_post_ra>
